<compile_context>
chip_gen: v7x
topology: tpu7x:2x2x1
jax: 0.10.0
libtpu: 0.0.40
codegen_flags: <defaults>
</compile_context>

<pallas_src>
import functools

import numpy as np
import jax
import jax.numpy as jnp
from jax import lax
from jax.experimental import pallas as pl
from jax.experimental.pallas import tpu as pltpu

LANE = 128
NEG_BIG = -1e30  # padded-logit bias (finite, so 0 * NEG_BIG stays finite)


def _pick_row_tile(n_rows):
    """Largest row tile that divides n_rows and keeps (8,128)-friendly blocks."""
    for t in (512, 256, 128, 64, 32, 16, 8):
        if n_rows % t == 0:
            return t
    return n_rows  # full extent is always a legal block dim


# --------------------------------------------------------------------------- #
# Pallas kernel: fused EOT scores + CE loss (+ analytic input gradient)       #
# --------------------------------------------------------------------------- #
def _make_kernel(num_classes, use_grad):
    def _forward(x, w, bias, y):
        # forward: scores = x @ W + bias   (MXU, bf16 in / f32 accumulate)
        scores = jnp.dot(x, w, preferred_element_type=jnp.float32) + bias  # (rt, S_pad)
        # numerically stable softmax / cross-entropy (padded lanes -> prob 0)
        m = jnp.max(scores, axis=-1, keepdims=True)
        ex = jnp.exp(scores - m)
        se = jnp.sum(ex, axis=-1, keepdims=True)
        lse = m + jnp.log(se)
        lane = lax.broadcasted_iota(jnp.int32, scores.shape, 1)   # (rt, S_pad)
        yoh = (lane == y).astype(jnp.float32)                     # one-hot in-kernel
        target = jnp.sum(scores * yoh, axis=-1, keepdims=True)    # (rt, 1)
        loss = lse - target                                       # (rt, 1) CE
        # lane-dense packed output slab: lanes [0:S] = scores, lane S = loss
        packed = (jnp.where(lane < num_classes, scores, 0.0)
                  + jnp.where(lane == num_classes, loss, 0.0))
        return packed, ex, se, yoh

    if use_grad:
        def kernel(x_ref, w_ref, wt_ref, b_ref, y_ref, out_ref, grad_ref):
            e = pl.program_id(1)  # EOT-batch accumulation axis (last grid axis)

            @pl.when(e == 0)
            def _():
                out_ref[...] = jnp.zeros_like(out_ref)
                grad_ref[...] = jnp.zeros_like(grad_ref)

            packed, ex, se, yoh = _forward(
                x_ref[...], w_ref[...], b_ref[...], y_ref[...])

            # analytic backward: dL/dx = (softmax - onehot) @ W^T  (MXU, bf16/f32)
            p = ex * pl.reciprocal(se, approx=True)               # EUP, ~free
            dscores = (p - yoh).astype(jnp.bfloat16)              # (rt, S_pad)
            grad = jnp.dot(dscores, wt_ref[...],
                           preferred_element_type=jnp.float32)    # (rt, D)

            # EOT accumulation: per-EOT-batch mean over bit-identical repeats equals
            # the single-copy value; summing across the e grid axis reproduces the
            # reference's "sum over EOT batches of per-batch means".
            out_ref[...] += packed
            grad_ref[...] += grad
    else:
        def kernel(x_ref, w_ref, b_ref, y_ref, out_ref):
            e = pl.program_id(1)

            @pl.when(e == 0)
            def _():
                out_ref[...] = jnp.zeros_like(out_ref)

            packed, _, _, _ = _forward(
                x_ref[...], w_ref[...], b_ref[...], y_ref[...])
            out_ref[...] += packed

    return kernel


# --------------------------------------------------------------------------- #
# Jitted device path (one pallas_call for the whole EOT loop)                 #
# --------------------------------------------------------------------------- #
@functools.partial(jax.jit, static_argnames=("EOT_num_batches", "use_grad"))
def _eot_device(x_batch, y_batch, W, bias, *, EOT_num_batches, use_grad=True):
    n_audios, n_channels, max_len = x_batch.shape
    D = n_channels * max_len
    S = W.shape[1]
    S_pad = ((S + 1 + LANE - 1) // LANE) * LANE  # room for the packed loss lane

    # wrapper-side layout plumbing (jitted, outside the kernel)
    x_flat = x_batch.reshape(n_audios, D).astype(jnp.bfloat16)
    W_pad = jnp.zeros((D, S_pad), jnp.float32).at[:, :S].set(W).astype(jnp.bfloat16)
    bias_pad = jnp.full((1, S_pad), NEG_BIG, jnp.float32).at[0, :S].set(bias.reshape(-1))
    y_col = y_batch.reshape(n_audios, 1).astype(jnp.int32)

    row_tile = _pick_row_tile(n_audios)
    grid = (n_audios // row_tile, EOT_num_batches)

    fwd_flops = 2 * n_audios * D * S_pad * EOT_num_batches
    flops = int(fwd_flops * (2 if use_grad else 1))                  # fwd (+ bwd) matmuls
    transcendentals = int(n_audios * (S_pad + 2) * EOT_num_batches)  # exp + log + recip
    bytes_accessed = int(x_flat.size * 2 + W_pad.size * 2 * (2 if use_grad else 1)
                         + bias_pad.size * 4 + y_col.size * 4
                         + n_audios * S_pad * 4
                         + (n_audios * D * 4 if use_grad else 0))

    in_specs = [
        pl.BlockSpec((row_tile, D), lambda i, e: (i, 0)),      # x   (resident over e)
        pl.BlockSpec((D, S_pad), lambda i, e: (0, 0)),         # W   (resident)
    ]
    args = [x_flat, W_pad]
    if use_grad:
        W_T_pad = W_pad.T                                      # pre-transposed once
        in_specs.append(pl.BlockSpec((S_pad, D), lambda i, e: (0, 0)))  # W^T (resident)
        args.append(W_T_pad)
    in_specs += [
        pl.BlockSpec((1, S_pad), lambda i, e: (0, 0)),          # bias
        pl.BlockSpec((row_tile, 1), lambda i, e: (i, 0)),       # labels (int32)
    ]
    args += [bias_pad, y_col]

    packed_spec = pl.BlockSpec((row_tile, S_pad), lambda i, e: (i, 0))   # accumulator
    if use_grad:
        out_shape = (jax.ShapeDtypeStruct((n_audios, S_pad), jnp.float32),
                     jax.ShapeDtypeStruct((n_audios, D), jnp.float32))
        out_specs = (packed_spec,
                     pl.BlockSpec((row_tile, D), lambda i, e: (i, 0)))   # accumulator
    else:
        out_shape = jax.ShapeDtypeStruct((n_audios, S_pad), jnp.float32)
        out_specs = packed_spec

    result = pl.pallas_call(
        _make_kernel(S, use_grad),
        out_shape=out_shape,
        grid_spec=pltpu.PrefetchScalarGridSpec(
            num_scalar_prefetch=0,
            grid=grid,
            in_specs=in_specs,
            out_specs=out_specs,
        ),
        compiler_params=pltpu.CompilerParams(
            dimension_semantics=("parallel", "arbitrary"),
            vmem_limit_bytes=32 * 1024 * 1024,
        ),
        cost_estimate=pl.CostEstimate(
            flops=flops, transcendentals=transcendentals,
            bytes_accessed=bytes_accessed),
    )(*args)

    if use_grad:
        packed, grad_flat = result
        grad = grad_flat.reshape(n_audios, n_channels, max_len)
    else:
        packed = result
        grad = None

    scores = packed[:, :S]                 # sum over EOT batches of per-batch means
    loss = packed[:, S]                    # same aggregation for the CE loss
    decisions = jnp.argmax(scores, axis=-1).astype(jnp.int32)
    return scores, loss, grad, decisions


# --------------------------------------------------------------------------- #
# EOT forward (mirrors EOT.forward of the PyTorch reference)                  #
# --------------------------------------------------------------------------- #
def eot_forward(x_batch, y_batch, W, bias,
                EOT_num_batches, EOT_batch_size, use_grad=True):
    n_audios = x_batch.shape[0]
    scores, loss, grad, dec = _eot_device(
        x_batch, y_batch, W, bias,
        EOT_num_batches=EOT_num_batches, use_grad=use_grad)

    # Single device->host transfer for the decision lists. With the deterministic
    # model every EOT repeat produces the same decision per audio, exactly as the
    # reference's per-batch argmax would.
    dec_host = np.asarray(jax.device_get(dec))
    n_repeats = EOT_num_batches * EOT_batch_size
    decisions = [[int(dec_host[ii])] * n_repeats for ii in range(n_audios)]
    return scores, loss, grad, decisions


# --------------------------------------------------------------------------- #
# pure-JAX reference (same synthetic model) for a correctness check           #
# --------------------------------------------------------------------------- #
def _reference(x_batch, y_batch, W, bias, EOT_num_batches):
    n_audios, C, L = x_batch.shape
    x = x_batch.reshape(n_audios, -1).astype(jnp.float32)
    s1 = x @ W + bias.reshape(-1)
    p = jax.nn.softmax(s1, axis=-1)
    oh = jax.nn.one_hot(y_batch, W.shape[1], dtype=jnp.float32)
    l1 = jax.nn.logsumexp(s1, axis=-1) - jnp.sum(s1 * oh, axis=-1)
    g1 = (p - oh) @ W.T
    return (EOT_num_batches * s1,
            EOT_num_batches * l1,
            (EOT_num_batches * g1).reshape(n_audios, C, L),
            jnp.argmax(s1, axis=-1))


# --------------------------------------------------------------------------- #
if __name__ == "__main__":
    # small shapes consistent with the module: x_batch is (n_audios, n_channels, max_len)
    n_audios, n_channels, max_len = 2, 1, 128
    n_spks = 8
    EOT_size, EOT_batch_size = 4, 2
    EOT_num_batches = EOT_size // EOT_batch_size
    D = n_channels * max_len

    key = jax.random.PRNGKey(0)
    kx, ky, kw, kb = jax.random.split(key, 4)

    x_batch = jax.random.normal(kx, (n_audios, n_channels, max_len), dtype=jnp.float32)
    y_batch = jax.random.randint(ky, (n_audios,), 0, n_spks, dtype=jnp.int32)

    # deterministic synthetic "speaker model" parameters
    W = 0.05 * jax.random.normal(kw, (D, n_spks), dtype=jnp.float32)
    bias = 0.01 * jax.random.normal(kb, (1, n_spks), dtype=jnp.float32)

    scores, loss, grad, decisions = eot_forward(
        x_batch, y_batch, W, bias, EOT_num_batches, EOT_batch_size, use_grad=True)
    jax.block_until_ready((scores, loss, grad))

    assert scores.shape == (n_audios, n_spks)
    assert loss.shape == (n_audios,)
    assert grad.shape == (n_audios, n_channels, max_len)
    assert len(decisions) == n_audios
    assert all(len(d) == EOT_num_batches * EOT_batch_size for d in decisions)

    # correctness vs pure-JAX reference (loose tolerances: bf16 MXU inputs)
    r_scores, r_loss, r_grad, r_dec = _reference(x_batch, y_batch, W, bias, EOT_num_batches)
    np.testing.assert_allclose(np.asarray(scores), np.asarray(r_scores), rtol=1e-1, atol=1e-1)
    np.testing.assert_allclose(np.asarray(loss), np.asarray(r_loss), rtol=1e-1, atol=1e-1)
    np.testing.assert_allclose(np.asarray(grad), np.asarray(r_grad), rtol=1e-1, atol=5e-2)
    assert all(decisions[ii][0] == int(r_dec[ii]) for ii in range(n_audios))

    # use_grad=False variant (skips backward matmul, W^T DMA and grad writeback)
    scores_ng, loss_ng, grad_ng, _ = eot_forward(
        x_batch, y_batch, W, bias, EOT_num_batches, EOT_batch_size, use_grad=False)
    jax.block_until_ready((scores_ng, loss_ng))
    assert grad_ng is None
    np.testing.assert_allclose(np.asarray(scores_ng), np.asarray(scores), rtol=1e-5, atol=1e-5)

    print("KERNEL_OK")
</pallas_src>

<mosaic_0001>
module attributes {stable_mosaic.version = 11 : i64} {
  func.func @kernel(%arg0: i32, %arg1: i32, %arg2: memref<2x128xbf16, #tpu.memory_space<vmem>>, %arg3: memref<128x128xbf16, #tpu.memory_space<vmem>>, %arg4: memref<128x128xbf16, #tpu.memory_space<vmem>>, %arg5: memref<1x128xf32, #tpu.memory_space<vmem>>, %arg6: memref<2x1xi32, #tpu.memory_space<vmem>>, %arg7: memref<2x128xf32, #tpu.memory_space<vmem>>, %arg8: memref<2x128xf32, #tpu.memory_space<vmem>>) attributes {dimension_semantics = [#tpu.dimension_semantics<parallel>, #tpu.dimension_semantics<arbitrary>], iteration_bounds = array<i64: 1, 2>, scalar_prefetch = 0 : i64, scratch_operands = 0 : i64, tpu.core_type = #tpu.core_type<tc>, window_params = [{transform_indices = @transform_0, window_bounds = array<i64: 2, 128>}, {pipeline_mode = #tpu.pipeline_mode<synchronous>, transform_indices = @transform_1, window_bounds = array<i64: 128, 128>}, {pipeline_mode = #tpu.pipeline_mode<synchronous>, transform_indices = @transform_2, window_bounds = array<i64: 128, 128>}, {pipeline_mode = #tpu.pipeline_mode<synchronous>, transform_indices = @transform_3, window_bounds = array<i64: 1, 128>}, {transform_indices = @transform_4, window_bounds = array<i64: 2, 1>}, {transform_indices = @transform_5, window_bounds = array<i64: 2, 128>}, {transform_indices = @transform_6, window_bounds = array<i64: 2, 128>}]} {
    %c0_i32 = arith.constant 0 : i32
    %0 = arith.cmpi eq, %arg1, %c0_i32 : i32
    %1 = arith.extui %0 : i1 to i32
    %c0_i32_0 = arith.constant 0 : i32
    %2 = arith.cmpi ne, %1, %c0_i32_0 : i32
    scf.if %2 {
      %cst_25 = arith.constant 0.000000e+00 : f32
      %52 = vector.broadcast %cst_25 : f32 to vector<2x128xf32>
      %c0_26 = arith.constant 0 : index
      %c0_27 = arith.constant 0 : index
      %53 = vector.load %arg7[%c0_26, %c0_27] : memref<2x128xf32, #tpu.memory_space<vmem>>, vector<2x128xf32>
      tpu.vector_store %arg7[%c0_26, %c0_27], %52 {strides = array<i32>} : memref<2x128xf32, #tpu.memory_space<vmem>>, vector<2x128xf32>,
      %cst_28 = arith.constant 0.000000e+00 : f32
      %54 = vector.broadcast %cst_28 : f32 to vector<2x128xf32>
      %c0_29 = arith.constant 0 : index
      %c0_30 = arith.constant 0 : index
      %55 = vector.load %arg8[%c0_29, %c0_30] : memref<2x128xf32, #tpu.memory_space<vmem>>, vector<2x128xf32>
      tpu.vector_store %arg8[%c0_29, %c0_30], %54 {strides = array<i32>} : memref<2x128xf32, #tpu.memory_space<vmem>>, vector<2x128xf32>,
    } else {
    }
    %c0 = arith.constant 0 : index
    %c0_1 = arith.constant 0 : index
    %3 = vector.load %arg2[%c0, %c0_1] : memref<2x128xbf16, #tpu.memory_space<vmem>>, vector<2x128xbf16>
    %c0_2 = arith.constant 0 : index
    %c0_3 = arith.constant 0 : index
    %4 = vector.load %arg3[%c0_2, %c0_3] : memref<128x128xbf16, #tpu.memory_space<vmem>>, vector<128x128xbf16>
    %c0_4 = arith.constant 0 : index
    %c0_5 = arith.constant 0 : index
    %5 = vector.load %arg5[%c0_4, %c0_5] : memref<1x128xf32, #tpu.memory_space<vmem>>, vector<1x128xf32>
    %c0_6 = arith.constant 0 : index
    %c0_7 = arith.constant 0 : index
    %6 = vector.load %arg6[%c0_6, %c0_7] : memref<2x1xi32, #tpu.memory_space<vmem>>, vector<2x1xi32>
    %cst = arith.constant dense<0.000000e+00> : vector<2x128xf32>
    %7 = tpu.matmul %3, %4, %cst {dimension_numbers = #tpu.dot_dimension_numbers<[1], [0], [0], [1], [0, 0, 1, 1], [], []>} : vector<2x128xbf16>, vector<128x128xbf16>, vector<2x128xf32> -> vector<2x128xf32>
    %8 = vector.broadcast %5 : vector<1x128xf32> to vector<2x128xf32>
    %9 = arith.addf %7, %8 : vector<2x128xf32>
    %cst_8 = arith.constant dense<0xFF800000> : vector<2xf32>
    %10 = vector.multi_reduction <maximumf>, %9, %cst_8 [1] : vector<2x128xf32> to vector<2xf32>
    %11 = vector.shape_cast %10 : vector<2xf32> to vector<2x1xf32>
    %12 = vector.broadcast %11 : vector<2x1xf32> to vector<2x128xf32>
    %13 = arith.subf %9, %12 : vector<2x128xf32>
    %14 = math.exp %13 : vector<2x128xf32>
    %cst_9 = arith.constant dense<0.000000e+00> : vector<2xf32>
    %15 = vector.multi_reduction <add>, %14, %cst_9 [1] : vector<2x128xf32> to vector<2xf32>
    %16 = vector.shape_cast %15 : vector<2xf32> to vector<2x1xf32>
    %17 = math.log %16 : vector<2x1xf32>
    %18 = arith.addf %11, %17 : vector<2x1xf32>
    %19 = tpu.iota {dimensions = array<i32: 1>} : vector<2x128xi32>
    %20 = vector.broadcast %6 : vector<2x1xi32> to vector<2x128xi32>
    %21 = arith.cmpi eq, %19, %20 : vector<2x128xi32>
    %22 = arith.extui %21 : vector<2x128xi1> to vector<2x128xi32>
    %23 = arith.sitofp %22 : vector<2x128xi32> to vector<2x128xf32>
    %24 = arith.mulf %9, %23 : vector<2x128xf32>
    %cst_10 = arith.constant dense<0.000000e+00> : vector<2xf32>
    %25 = vector.multi_reduction <add>, %24, %cst_10 [1] : vector<2x128xf32> to vector<2xf32>
    %26 = vector.shape_cast %25 : vector<2xf32> to vector<2x1xf32>
    %27 = arith.subf %18, %26 : vector<2x1xf32>
    %c8_i32 = arith.constant 8 : i32
    %28 = vector.broadcast %c8_i32 : i32 to vector<2x128xi32>
    %29 = arith.cmpi slt, %19, %28 : vector<2x128xi32>
    %cst_11 = arith.constant 0.000000e+00 : f32
    %30 = vector.broadcast %cst_11 : f32 to vector<2x128xf32>
    %31 = arith.select %29, %9, %30 : vector<2x128xi1>, vector<2x128xf32>
    %c8_i32_12 = arith.constant 8 : i32
    %32 = vector.broadcast %c8_i32_12 : i32 to vector<2x128xi32>
    %33 = arith.cmpi eq, %19, %32 : vector<2x128xi32>
    %cst_13 = arith.constant 0.000000e+00 : f32
    %34 = vector.shape_cast %27 : vector<2x1xf32> to vector<2x1xf32>
    %35 = vector.broadcast %34 : vector<2x1xf32> to vector<2x128xf32>
    %36 = vector.broadcast %cst_13 : f32 to vector<2x128xf32>
    %37 = arith.select %33, %35, %36 : vector<2x128xi1>, vector<2x128xf32>
    %38 = arith.addf %31, %37 : vector<2x128xf32>
    %39 = tpu.reciprocal %16 {approx = true} : vector<2x1xf32> -> vector<2x1xf32>
    %40 = vector.broadcast %39 : vector<2x1xf32> to vector<2x128xf32>
    %41 = arith.mulf %14, %40 : vector<2x128xf32>
    %42 = arith.subf %41, %23 : vector<2x128xf32>
    %43 = arith.truncf %42 : vector<2x128xf32> to vector<2x128xbf16>
    %c0_14 = arith.constant 0 : index
    %c0_15 = arith.constant 0 : index
    %44 = vector.load %arg4[%c0_14, %c0_15] : memref<128x128xbf16, #tpu.memory_space<vmem>>, vector<128x128xbf16>
    %cst_16 = arith.constant dense<0.000000e+00> : vector<2x128xf32>
    %45 = tpu.matmul %43, %44, %cst_16 {dimension_numbers = #tpu.dot_dimension_numbers<[1], [0], [0], [1], [0, 0, 1, 1], [], []>} : vector<2x128xbf16>, vector<128x128xbf16>, vector<2x128xf32> -> vector<2x128xf32>
    %c0_17 = arith.constant 0 : index
    %c0_18 = arith.constant 0 : index
    %46 = vector.load %arg7[%c0_17, %c0_18] : memref<2x128xf32, #tpu.memory_space<vmem>>, vector<2x128xf32>
    %47 = arith.addf %46, %38 : vector<2x128xf32>
    %c0_19 = arith.constant 0 : index
    %c0_20 = arith.constant 0 : index
    %48 = vector.load %arg7[%c0_19, %c0_20] : memref<2x128xf32, #tpu.memory_space<vmem>>, vector<2x128xf32>
    tpu.vector_store %arg7[%c0_19, %c0_20], %47 {strides = array<i32>} : memref<2x128xf32, #tpu.memory_space<vmem>>, vector<2x128xf32>,
    %c0_21 = arith.constant 0 : index
    %c0_22 = arith.constant 0 : index
    %49 = vector.load %arg8[%c0_21, %c0_22] : memref<2x128xf32, #tpu.memory_space<vmem>>, vector<2x128xf32>
    %50 = arith.addf %49, %45 : vector<2x128xf32>
    %c0_23 = arith.constant 0 : index
    %c0_24 = arith.constant 0 : index
    %51 = vector.load %arg8[%c0_23, %c0_24] : memref<2x128xf32, #tpu.memory_space<vmem>>, vector<2x128xf32>
    tpu.vector_store %arg8[%c0_23, %c0_24], %50 {strides = array<i32>} : memref<2x128xf32, #tpu.memory_space<vmem>>, vector<2x128xf32>,
    return
  }
  func.func @transform_0(%arg0: i32, %arg1: i32) -> (i32, i32) {
    %c0_i32 = arith.constant 0 : i32
    %c0_i32_0 = arith.constant 0 : i32
    return %arg0, %c0_i32 : i32, i32
  }
  func.func @transform_1(%arg0: i32, %arg1: i32) -> (i32, i32) {
    %c0_i32 = arith.constant 0 : i32
    %c0_i32_0 = arith.constant 0 : i32
    %c0_i32_1 = arith.constant 0 : i32
    return %c0_i32, %c0_i32_0 : i32, i32
  }
  func.func @transform_2(%arg0: i32, %arg1: i32) -> (i32, i32) {
    %c0_i32 = arith.constant 0 : i32
    %c0_i32_0 = arith.constant 0 : i32
    %c0_i32_1 = arith.constant 0 : i32
    return %c0_i32, %c0_i32_0 : i32, i32
  }
  func.func @transform_3(%arg0: i32, %arg1: i32) -> (i32, i32) {
    %c0_i32 = arith.constant 0 : i32
    %c0_i32_0 = arith.constant 0 : i32
    %c0_i32_1 = arith.constant 0 : i32
    return %c0_i32, %c0_i32_0 : i32, i32
  }
  func.func @transform_4(%arg0: i32, %arg1: i32) -> (i32, i32) {
    %c0_i32 = arith.constant 0 : i32
    %c0_i32_0 = arith.constant 0 : i32
    return %arg0, %c0_i32 : i32, i32
  }
  func.func @transform_5(%arg0: i32, %arg1: i32) -> (i32, i32) {
    %c0_i32 = arith.constant 0 : i32
    %c0_i32_0 = arith.constant 0 : i32
    return %arg0, %c0_i32 : i32, i32
  }
  func.func @transform_6(%arg0: i32, %arg1: i32) -> (i32, i32) {
    %c0_i32 = arith.constant 0 : i32
    %c0_i32_0 = arith.constant 0 : i32
    return %arg0, %c0_i32 : i32, i32
  }
}

</mosaic_0001>

<bundles_post_ra>
// kernel: _eot_device.1
= control target key start
LH: loop header
LB: loop body
LE: loop exit
PB: predicated region body
PF: predicated region fallthrough
CT: control target
= control target key end

     0   :  { %12 = vsyncpa [#allocation3], 0  ;;  %s884_s21 = smov 0   ;;  %s886_s22 = smov 0   ;;  %s1033_s0 = inlined_call_operand.vmem [shape: bf16[2,128], index: 0, kind: input, shape index: {}]   ;;  %s1034_s1 = inlined_call_operand.vmem [shape: bf16[128,128], index: 1, kind: input, shape index: {}]   ;;  %s1035_s2 = inlined_call_operand.vmem [shape: bf16[128,128], index: 2, kind: input, shape index: {}]   ;;  %s1036_s3 = inlined_call_operand.vmem [shape: f32[1,128], index: 3, kind: input, shape index: {}]   ;;  %s1037_s4 = inlined_call_operand.vmem [shape: s32[2,1], index: 4, kind: input, shape index: {}]   ;;  %s1038_s5 = inlined_call_operand.vmem [shape: f32[2,128], index: 5, kind: output, shape index: {0}]   ;;  %s1039_s6 = inlined_call_operand.hbm [shape: f32[2,128], index: 6, kind: output, shape index: {1}]  }
   0x1   :  { %s888_s23 = smov 0  }
   0x2 LB: > { %s644_s24 = sadd.s32 4294967295, %s842_s23   ;;  %s27_s25 = sadd.s32 1, %s838_s22  ;;  %s842_s23 = sphi %s888_s23, %s18_s23   ;;  %s838_s22 = sphi %s886_s22, %s1042_s22   ;;  %s834_s21 = sphi %s884_s21, %s1041_s21  }
   0x3   : > { %p28_p0 = scmp.ge.s32.totalorder %s27_s25, 2  ;;  %p648_p1 = scmp.ge.s32.totalorder %s842_s23, 1 }
   0x4   : > { %p235_p2 = scmp.lt.s32.totalorder %s842_s23, 3 }
   0x5   : > { %s1044_s25 = smov (%p28_p0, %s27_s25), 0 }
   0x6   : > { %p236_p3 = pnand %p648_p1, %p235_p2 }
   0x7   : > { %p649_p4 = scmp.ne.s32.totalorder (!%p236_p3), %s834_s21, 0 }
   0x8   : > { %239 = sbr.rel (%p236_p3) target bundleno = 817 (0x331), region = 40 }
   0xf   : > { %281 = sbr.rel (%p649_p4) target bundleno = 22 (0x16), region = 44  ;;  %v844_v0 = vmov (!%p649_p4), 0.0  }
  0x10   : > { %282 = vst [vmem:[%s1038_s5] sm:$0x3] (!%p649_p4), %v844_v0  ;;  %283 = vst [vmem:[#allocation2] sm:$0x3] (!%p649_p4), %v844_v0 }
  0x16 PF: > { %v768_v1 = vld [vmem:[%s1034_s1] sm:$0xff]   ;;  %v845_v2 = vmov 0.0   ;;  %v769_v3 = vld [vmem:[%s1034_s1 + $0x8] sm:$0xff]   ;;  %vm846_vm0 = vmmov 0   ;;  %v847_v4 = vmov 0   ;;  %v770_v5 = vld [vmem:[%s1034_s1 + $0x10] sm:$0xff]   ;;  %v410_v13 = vlaneseq }
  0x17   : > { %691 = vmatprep.subr.bf16.mxu0 %v845_v2  ;;  %711 = vmatprep.subr.bf16.mxu1 %v845_v2  ;;  %v302_v6 = vld [vmem:[%s1037_s4] sm:$0x3]  ;;  %v771_v7 = vld [vmem:[%s1034_s1 + $0x18] sm:$0xff]   ;;  %v773_v9 = vld [vmem:[%s1034_s1 + $0x28] sm:$0xff]   ;;  %vm397_vm2 = vcmask 1041408   ;;  %s848_s30 = smov [#allocation2]  }
  0x18   : > { %692 = vmatpush3.bf16.msra.mxu0 %v768_v1  ;;  %707 = vmatprep.mubr.msk.bf16.mxu0 %vm846_vm0, %v845_v2  ;;  %v772_v8 = vld [vmem:[%s1034_s1 + $0x20] sm:$0xff]   ;;  %v774_v10 = vld [vmem:[%s1034_s1 + $0x30] sm:$0xff]   ;;  %v775_v11 = vld [vmem:[%s1034_s1 + $0x38] sm:$0xff]   ;;  %v947_v14 = vand.u32 127, %v410_v13  ;;  %s558_s7 = sshll.u32 %s848_s30, 4  ;;  %p998_p5 = scmp.eq.s32.totalorder %s644_s24, 1  ;;  %s559_s7 = int_to_ptr.vmem [resolvable:$true] %s558_s7 }
  0x19   : > { %693 = vmatprep.subr.bf16.mxu0 %v845_v2  ;;  %766 = vset.pattern.permute.xlu1 %v847_v4  ;;  %v284_v12 = vld [vmem:[%s1033_s0] sm:$0x1]  ;;  %v777_v27 = vld [vmem:[%s1035_s2 + $0x8] sm:$0xff]   ;;  %v778_v28 = vld [vmem:[%s1035_s2 + $0x10] sm:$0xff]   ;;  %s790_s9 = scalar_lea.vmem %s559_s7, 32  ;;  %p797_p9 = scmp.lt.s32.totalorder %s559_s7, %s559_s7 }
  0x1a   : > { %727 = vmatprep.mubr.msk.bf16.mxu1 %vm846_vm0, %v845_v2  ;;  %767 = vset.pattern.permute.xlu0 %v847_v4  ;;  %v650_v16 = vld [vmem:[%s1036_s3] ss:$0 sm:$0xff]  ;;  %v779_v29 = vld [vmem:[%s1035_s2 + $0x18] sm:$0xff]   ;;  %v781_v36 = vld [vmem:[%s1035_s2 + $0x28] sm:$0xff]   ;;  %vm425_vm3 = vcmp.eq.s32.totalorder %v947_v14, 8  ;;  %vm423_vm4 = vcmp.lt.s32.totalorder %v947_v14, 8  ;;  %p791_p6 = scmp.ne.s32.totalorder %s559_s7, %s790_s9  ;;  %p798_p10 = scmp.lt.s32.totalorder %s790_s9, %s790_s9 }
  0x1b   : > { %413 = vperm.xlu1 %766, %v302_v6   ;;  %v776_v26 = vld [vmem:[%s1035_s2] sm:$0xff]   ;;  %v782_v37 = vld [vmem:[%s1035_s2 + $0x30] sm:$0xff]   ;;  %v783_v38 = vld [vmem:[%s1035_s2 + $0x38] sm:$0xff]  }
  0x1c   : > { %694 = vmatpush3.bf16.msra.mxu0 %v769_v3  ;;  %712 = vmatpush3.bf16.msra.mxu1 %v776_v26  ;;  %v780_v35 = vld [vmem:[%s1035_s2 + $0x20] sm:$0xff]   ;;  %p792_p7 = pnand %p791_p6, %p998_p5  ;;  %p799_p11 = por %p798_p10, %p797_p9 }
  0x1d   : > { %695 = vmatprep.subr.bf16.mxu0 %v845_v2  ;;  %713 = vmatprep.subr.bf16.mxu1 %v845_v2  ;;  %v536_v50 = vld [vmem:[%s1038_s5] sm:$0x3] }
  0x1e   : > { %v539_v54 = vld [vmem:[#allocation2] sm:$0x3]  ;;  %p793_p8 = pneg %p792_p7 }
  0x20   : > { %696 = vmatpush3.bf16.msra.mxu0 %v770_v5  ;;  %714 = vmatpush3.bf16.msra.mxu1 %v777_v27  ;;  %p800_p12 = pnand %p799_p11, %p793_p8 }
  0x21   : > { %697 = vmatprep.subr.bf16.mxu0 %v845_v2  ;;  %715 = vmatprep.subr.bf16.mxu1 %v845_v2 }
  0x24   : > { %698 = vmatpush3.bf16.msra.mxu0 %v771_v7  ;;  %716 = vmatpush3.bf16.msra.mxu1 %v778_v28 }
  0x25   : > { %699 = vmatprep.subr.bf16.mxu0 %v845_v2  ;;  %717 = vmatprep.subr.bf16.mxu1 %v845_v2 }
  0x28   : > { %700 = vmatpush3.bf16.msra.mxu0 %v772_v8  ;;  %718 = vmatpush3.bf16.msra.mxu1 %v779_v29 }
  0x29   : > { %701 = vmatprep.subr.bf16.mxu0 %v845_v2  ;;  %719 = vmatprep.subr.bf16.mxu1 %v845_v2 }
  0x2c   : > { %702 = vmatpush3.bf16.msra.mxu0 %v773_v9  ;;  %720 = vmatpush3.bf16.msra.mxu1 %v780_v35 }
  0x2d   : > { %703 = vmatprep.subr.bf16.mxu0 %v845_v2  ;;  %721 = vmatprep.subr.bf16.mxu1 %v845_v2 }
  0x30   : > { %704 = vmatpush3.bf16.msra.mxu0 %v774_v10  ;;  %722 = vmatpush3.bf16.msra.mxu1 %v781_v36 }
  0x31   : > { %705 = vmatprep.subr.bf16.mxu0 %v845_v2  ;;  %723 = vmatprep.subr.bf16.mxu1 %v845_v2 }
  0x34   : > { %706 = vmatpush3.bf16.msra.mxu0 %v775_v11  ;;  %724 = vmatpush3.bf16.msra.mxu1 %v782_v37 }
  0x35   : > { %725 = vmatprep.subr.bf16.mxu1 %v845_v2 }
  0x37   : > { %708 = vmatmul.mubr.bf16.vlgmr.msra.gmra.mrb[0].mxu0 %v284_v12 }
  0x38   : > { %726 = vmatpush3.bf16.msra.mxu1 %v783_v38 }
  0x9a   : > { %v414_v15 = vpop.permute.xlu1 %413 }
  0x9b   : > { %vm415_vm1 = vcmp.eq.s32.totalorder %v947_v14, %v414_v15 }
  0x9c   : > { %v659_v17 = vsel %vm415_vm1, 1.0, %v845_v2 }
 0x10a   : > { %v391_v18 = vpop.f32.mrb[0].mxu0 }
 0x10b   : > { %v392_v19 = vadd.f32 %v650_v16, %v391_v18  ;;  %v709_v20 = vpop.f32.mrb[1].mxu0 }
 0x10c   : > { %v394_v21 = vpop.f32.mrb[2].mxu0 }
 0x10d   : > { %v710_v22 = vpop.f32.mrb[3].mxu0  ;;  %v398_v23 = vsel %vm397_vm2, %v392_v19, -inf  ;;  %v418_v24 = vmul.f32 %v659_v17, %v392_v19  ;;  %v424_v49 = vsel %vm423_vm4, %v392_v19, 0.0 }
 0x10e   : > { %399 = vmax.xlane.f32.xlu0 %v398_v23 }
 0x10f   : > { %v419_v25 = vsel %vm397_vm2, %v418_v24, 0.0 }
 0x110   : > { %420 = vadd.xlane.f32.xlu1 %v419_v25 }
 0x19b   : > { %v400_v30 = vpop.xlane.xlu0 %399 }
 0x19c   : > { %v401_v31 = vsub.f32 %v392_v19, %v400_v30 }
 0x19d   : > { %v421_v45 = vpop.xlane.xlu1 %420 }
 0x19e   : > { %v402_v32 = vmul.f32 1.442695, %v401_v31 }
 0x1a0   : > { %784 = vpow2.f32 %v402_v32 }
 0x1aa   : > { %v785_v33 = vpop.eup %784 }
 0x1ab   : > { %v404_v34 = vsel %vm397_vm2, %v785_v33, 0.0 }
 0x1ac   : > { %405 = vadd.xlane.f32.xlu0 %v404_v34 }
 0x239   : > { %v406_v39 = vpop.xlane.xlu0 %405 }
 0x23a   : > { %786 = vlog2.f32 %v406_v39 }
 0x23b   : > { %788 = vrcp.f32 %v406_v39 }
 0x244   : > { %v787_v40 = vpop.eup %786 }
 0x245   : > { %v789_v41 = vpop.eup %788  ;;  %v408_v42 = vmul.f32 0.6931472, %v787_v40 }
 0x246   : > { %v429_v43 = vmul.f32 %v789_v41, %v785_v33 }
 0x247   : > { %v409_v44 = vadd.f32 %v408_v42, %v400_v30 }
 0x248   : > { %v430_v46 = vsub.f32 %v429_v43, %v659_v17 }
 0x249   : > { %v422_v47 = vsub.f32 %v409_v44, %v421_v45 }
 0x24a   : > { %v431_v48 = vpack.c.bf16 %v430_v46, %v430_v46 }
 0x24b   : > { %v426_v51 = vsel %vm425_vm3, %v422_v47, 0.0 }
 0x24c   : > { %v427_v52 = vadd.f32 %v426_v51, %v424_v49  ;;  %728 = vmatmul.mubr.bf16.vlgmr.msra.gmra.mrb[0].mxu1 %v431_v48 }
 0x24e   : > { %v537_v53 = vadd.f32 %v536_v50, %v427_v52 }
 0x250   : > { %538 = vst [vmem:[%s1038_s5] sm:$0x3] %v537_v53 }
 0x31f   : > { %v530_v55 = vpop.f32.mrb[0].mxu1 }
 0x320   : > { %v540_v56 = vadd.f32 %v539_v54, %v530_v55  ;;  %v729_v57 = vpop.f32.mrb[1].mxu1 }
 0x321   : > { %v533_v58 = vpop.f32.mrb[2].mxu1 }
 0x322   : > { %541 = vst [vmem:[#allocation2] sm:$0x3] %v540_v56  ;;  %v730_v59 = vpop.f32.mrb[3].mxu1 }
 0x323   : > { %803 = shalt.err (!%p800_p12)
}
 0x324   : > { %s804_s11 = scalar_lea.hbm %s1039_s6, 32 }
 0x325   : > { %p805_p13 = scmp.ne.s32.totalorder %s1039_s6, %s804_s11  ;;  %p810_p2 = scmp.lt.u32.totalorder %s804_s11, %s1039_s6 }
 0x327   : > { %p806_p0 = pnand %p805_p13, %p998_p5 }
 0x329   : > { %p807_p1 = pneg %p806_p0 }
 0x32b   : > { %p812_p3 = pnand %p810_p2, %p807_p1 }
 0x32d   : > { %815 = shalt.err (!%p812_p3)
}
 0x32e   : > { %732 = dma.vmem_to_hbm [thread:$0]  (%p998_p5), %s559_s7, 32, %s1039_s6, [#allocation3]  }
 0x32f   : > { %829 = dma.done.wait (%p998_p5), [#allocation3], 32  }
 0x330   : > { %831 = vsyncadd (%p998_p5), [#allocation3], 4294967264 }
 0x331 PF: > { %s18_s23 = sadd.s32 1, %s842_s23   ;;  %s1041_s21 = smov %s838_s22 }
 0x332   : > { %p15_p4 = scmp.ge.s32.totalorder %s18_s23, 4   ;;  %s1042_s22 = smov %s1044_s25 }
 0x334   :  { %17 = sbr.rel (!%p15_p4) target bundleno = 2 (0x2), region = 87 }
 0x33b   :  { %578 = vsyncpa [#allocation3], 1 }
 0x33c   :  { %580 = vsyncpa [#allocation3 + $0x1], 1 }

</bundles_post_ra>
